<compile_context>
chip_gen: v6e
topology: v6e:2x2x1
jax: 0.10.0
libtpu: 0.0.40
codegen_flags: <defaults>
</compile_context>

<pallas_src>
import functools
import math

import numpy as np
import jax
import jax.numpy as jnp
from jax import lax
from jax.experimental import pallas as pl
from jax.experimental.pallas import tpu as pltpu

LANES = 128
SUBLANES = 8
_LOG_TWO_PI = math.log(2.0 * 3.1415926)   # matches the PyTorch literal constant


def _round_up(x: int, m: int) -> int:
    return ((x + m - 1) // m) * m


def _device_plan():
    """Returns (target_tile_rows, num_core_splits, vmem_limit_bytes) per TPU gen."""
    try:
        kind = jax.devices()[0].device_kind.lower()
    except Exception:
        kind = ""
    if "v5e" in kind or "v5 lite" in kind or "v5lite" in kind:
        # v5e: 16 MiB default scoped VMEM, ~0.8 TB/s HBM -> 2048 rows is plenty.
        return 2048, 1, 64 << 20
    if "v7" in kind:
        # v7x: 64 MiB physical VMEM, 3.2 TB/s HBM, 2 TensorCores per device.
        return 4096, 2, 48 << 20
    if "v4" in kind or "v5p" in kind or "v5" in kind:
        # Megacore chips: 2 TensorCores behind one device.
        return 4096, 2, 64 << 20
    # v6e / unknown: large tiles, single core.
    return 4096, 1, 64 << 20


def _nll_sum_kernel(mean_ref, logvar_ref, tgt_ref, out_ref, *,
                    tile_rows, acc_rows, num_tiles, full_rows, rem,
                    needs_mask, has_overflow):
    c = pl.program_id(0)                       # core-split axis ("parallel")
    i = pl.program_id(1)                       # reduction axis ("arbitrary")
    g = c * pl.num_programs(1) + i             # global tile index

    @pl.when(i == 0)
    def _init():
        out_ref[...] = jnp.zeros_like(out_ref)

    m = mean_ref[...].astype(jnp.float32)
    lv = logvar_ref[...].astype(jnp.float32)
    t = tgt_ref[...].astype(jnp.float32)

    var = jnp.exp(lv) + jnp.float32(1e-6)
    # Reciprocal-multiply instead of a VALU divide. approx=True would move it
    # fully onto the EUP slot but loosens low-order bits; keep exact here.
    inv_var = pl.reciprocal(var, approx=False)
    diff = t - m
    # Full nll = 0.5*(log(2*pi) + core); the 0.5 and log(2*pi) are applied once
    # to the final mean in the wrapper.
    core = jnp.log(var) + diff * diff * inv_var

    groups = tile_rows // acc_rows

    def fold(x):
        # (tile_rows,128) -> (groups, acc_rows, 128) -> sum over groups.
        # Pure vreg-wise VPU adds; no cross-lane work in the steady state.
        return x.reshape(groups, acc_rows, LANES).sum(axis=0)

    if needs_mask:
        @pl.when(g < num_tiles - 1)
        def _bulk():
            out_ref[...] += fold(core)

        @pl.when(g == num_tiles - 1)
        def _edge():
            # Only the last valid tile can contain padding / out-of-bounds rows.
            # Compare (row, lane) indices -> no 32-bit flat-index overflow.
            base = (num_tiles - 1) * tile_rows
            row = base + lax.broadcasted_iota(jnp.int32, (tile_rows, LANES), 0)
            valid = row < full_rows
            if rem:
                col = lax.broadcasted_iota(jnp.int32, (tile_rows, LANES), 1)
                valid = jnp.logical_or(
                    valid, jnp.logical_and(row == full_rows, col < rem))
            out_ref[...] += fold(jnp.where(valid, core, 0.0))
    elif has_overflow:
        # Last core may have a few grid steps past the end of the data.
        @pl.when(g < num_tiles)
        def _bulk():
            out_ref[...] += fold(core)
    else:
        out_ref[...] += fold(core)


def probabilistic_loss(predictions, targets, *, tile_rows=None, num_splits=None):
    """Pallas equivalent of ProbabilisticLoss.forward((mean, log_var), targets)."""
    mean, log_var = predictions
    assert mean.shape == log_var.shape == targets.shape

    n = int(np.prod(mean.shape))

    target_rows, auto_splits, vmem_limit = _device_plan()
    if tile_rows is None:
        tile_rows = target_rows
    if num_splits is None:
        num_splits = auto_splits

    full_rows, rem = divmod(n, LANES)
    if rem == 0 and full_rows >= SUBLANES:
        rows, pad_amt = full_rows, 0          # zero-copy ravel + reshape
    else:
        rows = max(SUBLANES, _round_up(pl.cdiv(n, LANES), SUBLANES))
        pad_amt = rows * LANES - n
        # TODO(synk): a manual-DMA path could avoid this pad copy for ragged n.

    def prep(x):
        x = jnp.ravel(x)
        if x.dtype != jnp.bfloat16:           # keep bf16 narrow; upcast in-kernel
            x = x.astype(jnp.float32)
        if pad_amt:
            x = jnp.pad(x, (0, pad_amt))
        return x.reshape(rows, LANES)

    m2, lv2, t2 = prep(mean), prep(log_var), prep(targets)

    # Tile rows: big (multiple of 8, never larger than the slab) to amortize the
    # ~0.35 us per-grid-step overhead.
    max_rows = (rows // SUBLANES) * SUBLANES
    tile_rows = max(SUBLANES, min((int(tile_rows) // SUBLANES) * SUBLANES, max_rows))
    acc_rows = 64 if tile_rows % 64 == 0 else SUBLANES

    num_tiles = pl.cdiv(rows, tile_rows)
    num_splits = max(1, min(int(num_splits), num_tiles))
    tpc = pl.cdiv(num_tiles, num_splits)      # tiles per core-split
    has_overflow = num_splits * tpc > num_tiles
    needs_mask = num_tiles * tile_rows * LANES != n

    if has_overflow:
        def in_idx(c, i):
            return (jnp.minimum(c * tpc + i, num_tiles - 1), 0)
    else:
        def in_idx(c, i):
            return (c * tpc + i, 0)

    kernel = functools.partial(
        _nll_sum_kernel, tile_rows=tile_rows, acc_rows=acc_rows,
        num_tiles=num_tiles, full_rows=full_rows, rem=rem,
        needs_mask=needs_mask, has_overflow=has_overflow)

    out_bytes = num_splits * acc_rows * LANES * 4
    cost = pl.CostEstimate(
        flops=8 * n, transcendentals=3 * n,
        bytes_accessed=m2.nbytes + lv2.nbytes + t2.nbytes + out_bytes)

    partials = pl.pallas_call(
        kernel,
        out_shape=jax.ShapeDtypeStruct((num_splits, acc_rows, LANES), jnp.float32),
        grid_spec=pltpu.PrefetchScalarGridSpec(
            num_scalar_prefetch=0,
            grid=(num_splits, tpc),
            in_specs=[pl.BlockSpec((tile_rows, LANES), in_idx) for _ in range(3)],
            out_specs=pl.BlockSpec((None, acc_rows, LANES), lambda c, i: (c, 0, 0)),
        ),
        compiler_params=pltpu.CompilerParams(
            dimension_semantics=("parallel", "arbitrary"),
            vmem_limit_bytes=vmem_limit),
        cost_estimate=cost,
    )(m2, lv2, t2)

    total = jnp.sum(partials, dtype=jnp.float32)
    # mean(nll) = 0.5*log(2*pi) + 0.5 * mean(log(var) + diff^2/var)
    return 0.5 * (total / jnp.float32(n)) + jnp.float32(0.5 * _LOG_TWO_PI)


def _reference(predictions, targets):
    mean, log_var = predictions
    mean = mean.astype(jnp.float32)
    log_var = log_var.astype(jnp.float32)
    targets = targets.astype(jnp.float32)
    var = jnp.exp(log_var) + 1e-6
    nll = 0.5 * jnp.log(2.0 * 3.1415926 * var) + 0.5 * (targets - mean) ** 2 / var
    return jnp.mean(nll)


def _check(mean, log_var, targets, **kwargs):
    loss = jax.block_until_ready(probabilistic_loss((mean, log_var), targets, **kwargs))
    ref = jax.block_until_ready(_reference((mean, log_var), targets))
    np.testing.assert_allclose(np.asarray(loss), np.asarray(ref),
                               rtol=1e-5, atol=1e-5)


if __name__ == "__main__":
    key = jax.random.PRNGKey(0)
    ka, kb, kc, kd = jax.random.split(key, 4)

    # Primary small shape consistent with a regression head: (B=2, C=4, 16, 16).
    shape = (2, 4, 16, 16)
    k1, k2, k3 = jax.random.split(ka, 3)
    mean = jax.random.normal(k1, shape, dtype=jnp.float32)
    log_var = 0.5 * jax.random.normal(k2, shape, dtype=jnp.float32)
    targets = jax.random.normal(k3, shape, dtype=jnp.float32)

    # 1) Default plan (single tile on this size, generation-aware config).
    _check(mean, log_var, targets)
    # 2) Multi-tile grid + explicit 2-way core split (exercises the parallel axis).
    _check(mean, log_var, targets, tile_rows=8, num_splits=2)
    # 3) bf16 inputs (narrow HBM reads, in-kernel upcast).
    _check(mean.astype(jnp.bfloat16), log_var.astype(jnp.bfloat16),
           targets.astype(jnp.bfloat16))

    # 4) Ragged element count: lane padding + masked final tile.
    shape2 = (3, 5, 7, 11)
    k1, k2, k3 = jax.random.split(kb, 3)
    _check(jax.random.normal(k1, shape2, dtype=jnp.float32),
           0.5 * jax.random.normal(k2, shape2, dtype=jnp.float32),
           jax.random.normal(k3, shape2, dtype=jnp.float32))

    # 5) Partial last block + core split with an overflow grid step.
    shape3 = (2, 4, 96, 96)
    k1, k2, k3 = jax.random.split(kc, 3)
    _check(jax.random.normal(k1, shape3, dtype=jnp.float32),
           0.5 * jax.random.normal(k2, shape3, dtype=jnp.float32),
           jax.random.normal(k3, shape3, dtype=jnp.float32),
           tile_rows=256, num_splits=2)

    print("KERNEL_OK")
</pallas_src>

<mosaic_0001>
module attributes {stable_mosaic.version = 11 : i64} {
  func.func @_nll_sum_kernel(%arg0: i32, %arg1: i32, %arg2: memref<16x128xf32, #tpu.memory_space<vmem>>, %arg3: memref<16x128xf32, #tpu.memory_space<vmem>>, %arg4: memref<16x128xf32, #tpu.memory_space<vmem>>, %arg5: memref<1x8x128xf32, #tpu.memory_space<vmem>>) attributes {dimension_semantics = [#tpu.dimension_semantics<parallel>, #tpu.dimension_semantics<arbitrary>], iteration_bounds = array<i64: 1, 1>, scalar_prefetch = 0 : i64, scratch_operands = 0 : i64, tpu.core_type = #tpu.core_type<tc>, window_params = [{transform_indices = @transform_0, window_bounds = array<i64: 16, 128>}, {transform_indices = @transform_1, window_bounds = array<i64: 16, 128>}, {transform_indices = @transform_2, window_bounds = array<i64: 16, 128>}, {transform_indices = @transform_3, window_bounds = array<i64: 1, 8, 128>}]} {
    %c0_i32 = arith.constant 0 : i32
    %0 = arith.cmpi eq, %arg1, %c0_i32 : i32
    %1 = arith.extui %0 : i1 to i32
    %c0_i32_0 = arith.constant 0 : i32
    %2 = arith.cmpi ne, %1, %c0_i32_0 : i32
    scf.if %2 {
      %cst_13 = arith.constant 0.000000e+00 : f32
      %23 = vector.broadcast %cst_13 : f32 to vector<8x128xf32>
      %c0_14 = arith.constant 0 : index
      %c0_15 = arith.constant 0 : index
      %c0_16 = arith.constant 0 : index
      %24 = vector.load %arg5[%c0_14, %c0_15, %c0_16] : memref<1x8x128xf32, #tpu.memory_space<vmem>>, vector<1x8x128xf32>
      %25 = vector.shape_cast %24 : vector<1x8x128xf32> to vector<8x128xf32>
      %26 = vector.shape_cast %23 : vector<8x128xf32> to vector<1x8x128xf32>
      tpu.vector_store %arg5[%c0_14, %c0_15, %c0_16], %26 {strides = array<i32>} : memref<1x8x128xf32, #tpu.memory_space<vmem>>, vector<1x8x128xf32>,
    } else {
    }
    %c0 = arith.constant 0 : index
    %c0_1 = arith.constant 0 : index
    %3 = vector.load %arg2[%c0, %c0_1] : memref<16x128xf32, #tpu.memory_space<vmem>>, vector<16x128xf32>
    %c0_2 = arith.constant 0 : index
    %c0_3 = arith.constant 0 : index
    %4 = vector.load %arg3[%c0_2, %c0_3] : memref<16x128xf32, #tpu.memory_space<vmem>>, vector<16x128xf32>
    %c0_4 = arith.constant 0 : index
    %c0_5 = arith.constant 0 : index
    %5 = vector.load %arg4[%c0_4, %c0_5] : memref<16x128xf32, #tpu.memory_space<vmem>>, vector<16x128xf32>
    %6 = math.exp %4 : vector<16x128xf32>
    %cst = arith.constant 9.99999997E-7 : f32
    %7 = vector.broadcast %cst : f32 to vector<16x128xf32>
    %8 = arith.addf %6, %7 : vector<16x128xf32>
    %9 = tpu.reciprocal %8 : vector<16x128xf32> -> vector<16x128xf32>
    %10 = arith.subf %5, %3 : vector<16x128xf32>
    %11 = math.log %8 : vector<16x128xf32>
    %12 = arith.mulf %10, %10 : vector<16x128xf32>
    %13 = arith.mulf %12, %9 : vector<16x128xf32>
    %14 = arith.addf %11, %13 : vector<16x128xf32>
    %c0_6 = arith.constant 0 : index
    %c0_7 = arith.constant 0 : index
    %c0_8 = arith.constant 0 : index
    %15 = vector.load %arg5[%c0_6, %c0_7, %c0_8] : memref<1x8x128xf32, #tpu.memory_space<vmem>>, vector<1x8x128xf32>
    %16 = vector.shape_cast %15 : vector<1x8x128xf32> to vector<8x128xf32>
    %17 = vector.shape_cast %14 : vector<16x128xf32> to vector<2x8x128xf32>
    %cst_9 = arith.constant dense<0.000000e+00> : vector<8x128xf32>
    %18 = vector.multi_reduction <add>, %17, %cst_9 [0] : vector<2x8x128xf32> to vector<8x128xf32>
    %19 = arith.addf %16, %18 : vector<8x128xf32>
    %c0_10 = arith.constant 0 : index
    %c0_11 = arith.constant 0 : index
    %c0_12 = arith.constant 0 : index
    %20 = vector.load %arg5[%c0_10, %c0_11, %c0_12] : memref<1x8x128xf32, #tpu.memory_space<vmem>>, vector<1x8x128xf32>
    %21 = vector.shape_cast %20 : vector<1x8x128xf32> to vector<8x128xf32>
    %22 = vector.shape_cast %19 : vector<8x128xf32> to vector<1x8x128xf32>
    tpu.vector_store %arg5[%c0_10, %c0_11, %c0_12], %22 {strides = array<i32>} : memref<1x8x128xf32, #tpu.memory_space<vmem>>, vector<1x8x128xf32>,
    return
  }
  func.func @transform_0(%arg0: i32, %arg1: i32) -> (i32, i32) {
    %c1_i32 = arith.constant 1 : i32
    %0 = arith.muli %arg0, %c1_i32 : i32
    %1 = arith.addi %0, %arg1 : i32
    %c0_i32 = arith.constant 0 : i32
    %c0_i32_0 = arith.constant 0 : i32
    return %1, %c0_i32 : i32, i32
  }
  func.func @transform_1(%arg0: i32, %arg1: i32) -> (i32, i32) {
    %c1_i32 = arith.constant 1 : i32
    %0 = arith.muli %arg0, %c1_i32 : i32
    %1 = arith.addi %0, %arg1 : i32
    %c0_i32 = arith.constant 0 : i32
    %c0_i32_0 = arith.constant 0 : i32
    return %1, %c0_i32 : i32, i32
  }
  func.func @transform_2(%arg0: i32, %arg1: i32) -> (i32, i32) {
    %c1_i32 = arith.constant 1 : i32
    %0 = arith.muli %arg0, %c1_i32 : i32
    %1 = arith.addi %0, %arg1 : i32
    %c0_i32 = arith.constant 0 : i32
    %c0_i32_0 = arith.constant 0 : i32
    return %1, %c0_i32 : i32, i32
  }
  func.func @transform_3(%arg0: i32, %arg1: i32) -> (i32, i32, i32) {
    %c0_i32 = arith.constant 0 : i32
    %c0_i32_0 = arith.constant 0 : i32
    %c0_i32_1 = arith.constant 0 : i32
    return %arg0, %c0_i32, %c0_i32_0 : i32, i32, i32
  }
}

</mosaic_0001>

<bundles_post_ra>
// kernel: tpu_custom_call.1
= control target key start
LH: loop header
LB: loop body
LE: loop exit
PB: predicated region body
PF: predicated region fallthrough
CT: control target
= control target key end

     0   :  { %8 = vsyncpa [#allocation3], 0  ;;  %s268_s0 = inlined_call_operand.hbm [shape: f32[16,128], index: 0, kind: input, shape index: {}]   ;;  %s269_s1 = inlined_call_operand.hbm [shape: f32[16,128], index: 1, kind: input, shape index: {}]   ;;  %s270_s2 = inlined_call_operand.hbm [shape: f32[16,128], index: 2, kind: input, shape index: {}]   ;;  %s271_s3 = inlined_call_operand.hbm [shape: f32[1,8,128], index: 3, kind: output, shape index: {}]  }
   0x1   :  { %9 = vsyncpa [#allocation6], 0 }
   0x2   :  { %10 = vsyncpa [#allocation4], 0  ;;  %s230_s12 = smov [#allocation5]   ;;  %s231_s14 = smov [#allocation2]  }
   0x3   :  { %s36_s13 = sshll.u32 %s230_s12, 4  ;;  %s20_s15 = sshll.u32 %s231_s14, 4  ;;  %s37_s13 = int_to_ptr.vmem [resolvable:$true] %s36_s13  ;;  %s21_s15 = int_to_ptr.vmem [resolvable:$true] %s20_s15 }
   0x4   :  { %s152_s16 = scalar_lea.vmem %s37_s13, 256  ;;  %p157_p1 = scmp.lt.s32.totalorder %s37_s13, %s37_s13 }
   0x5   :  { %p153_p0 = scmp.ne.s32.totalorder %s37_s13, %s152_s16  ;;  %p158_p2 = scmp.lt.s32.totalorder %s152_s16, %s152_s16 }
   0x7   :  { %p159_p3 = por %p158_p2, %p157_p1 }
   0x9   :  { %p160_p4 = pnand %p159_p3, %p153_p0 }
   0xb   :  { %163 = shalt.err (!%p160_p4)
}
   0xc   :  { %s232_s17 = smov 128   ;;  %s233_s18 = smov 8  }
   0xd   :  { %42 = dma.hbm_to_vmem [thread:$0]  %s269_s1, 256, %s37_s13, [#allocation6], %s232_s17, %s232_s17, %s233_s18  }
   0xe   :  { %s172_s21 = scalar_lea.vmem %s21_s15, 256  ;;  %p177_p6 = scmp.lt.s32.totalorder %s21_s15, %s21_s15 }
   0xf   :  { %p173_p5 = scmp.ne.s32.totalorder %s21_s15, %s172_s21  ;;  %p178_p7 = scmp.lt.s32.totalorder %s172_s21, %s172_s21 }
  0x11   :  { %p179_p8 = por %p178_p7, %p177_p6 }
  0x13   :  { %p180_p9 = pnand %p179_p8, %p173_p5 }
  0x15   :  { %183 = shalt.err (!%p180_p9)
}
  0x16   :  { %26 = dma.hbm_to_vmem [thread:$0]  %s268_s0, 256, %s21_s15, [#allocation3], %s232_s17, %s232_s17, %s233_s18  }
  0x17   :  { %s234_s24 = smov [#allocation7]  }
  0x18   :  { %s52_s25 = sshll.u32 %s234_s24, 4  ;;  %s53_s25 = int_to_ptr.vmem [resolvable:$true] %s52_s25 }
  0x19   :  { %s192_s26 = scalar_lea.vmem %s53_s25, 256  ;;  %p197_p11 = scmp.lt.s32.totalorder %s53_s25, %s53_s25 }
  0x1a   :  { %p193_p10 = scmp.ne.s32.totalorder %s53_s25, %s192_s26  ;;  %p198_p12 = scmp.lt.s32.totalorder %s192_s26, %s192_s26 }
  0x1c   :  { %p199_p13 = por %p198_p12, %p197_p11 }
  0x1e   :  { %p200_p0 = pnand %p199_p13, %p193_p10 }
  0x20   :  { %203 = shalt.err (!%p200_p0)
}
  0x21   :  { %58 = dma.hbm_to_vmem [thread:$0]  %s270_s2, 256, %s53_s25, [#allocation6], %s232_s17, %s232_s17, %s233_s18  }
  0x22   :  { %224 = dma.done.wait [#allocation3], 256  }
  0x23   :  { %225 = vsyncadd [#allocation3], 4294967040 }
  0x24   :  { %226 = dma.done.wait [#allocation6], 512  }
  0x25   :  { %227 = vsyncadd [#allocation6], 4294966784  ;;  %v81_v0 = vld [vmem:[#allocation5] sm:$0xff]  ;;  %v82_v1 = vld [vmem:[#allocation5 + $0x8] sm:$0xff]  ;;  %s235_s0 = smov [#allocation8]  }
  0x26   :  { %v85_v2 = vmul.f32 1.442695, %v81_v0  ;;  %v87_v3 = vmul.f32 1.442695, %v82_v1  ;;  %v79_v8 = vld [vmem:[#allocation2] sm:$0xff]  ;;  %v80_v10 = vld [vmem:[#allocation2 + $0x8] sm:$0xff] }
  0x27   :  { %v83_v9 = vld [vmem:[#allocation7] sm:$0xff]  ;;  %v84_v11 = vld [vmem:[#allocation7 + $0x8] sm:$0xff]  ;;  %s115_s2 = sshll.u32 %s235_s0, 4  ;;  %s116_s2 = int_to_ptr.vmem [resolvable:$true] %s115_s2 }
  0x28   :  { %132 = vpow2.f32 %v85_v2  ;;  %v93_v12 = vsub.f32 %v83_v9, %v79_v8  ;;  %v94_v13 = vsub.f32 %v84_v11, %v80_v10  ;;  %s204_s28 = scalar_lea.vmem %s116_s2, 128  ;;  %p209_p2 = scmp.lt.s32.totalorder %s116_s2, %s116_s2 }
  0x29   :  { %134 = vpow2.f32 %v87_v3  ;;  %p205_p1 = scmp.ne.s32.totalorder %s116_s2, %s204_s28  ;;  %p210_p3 = scmp.lt.s32.totalorder %s204_s28, %s204_s28 }
  0x2a   :  { %v99_v14 = vmul.f32 %v93_v12, %v93_v12  ;;  %v100_v15 = vmul.f32 %v94_v13, %v94_v13 }
  0x2b   :  { %p211_p4 = por %p210_p3, %p209_p2 }
  0x2d   :  { %p212_p5 = pnand %p211_p4, %p205_p1 }
  0x35   :  { %v133_v4 = vpop.eup %132 }
  0x36   :  { %v135_v5 = vpop.eup %134  ;;  %v89_v6 = vadd.f32 1e-06, %v133_v4 }
  0x37   :  { %v90_v7 = vadd.f32 1e-06, %v135_v5 }
  0x38   :  { %136 = vrcp.f32 %v89_v6 }
  0x39   :  { %138 = vrcp.f32 %v90_v7 }
  0x3a   :  { %140 = vlog2.f32 %v89_v6 }
  0x3b   :  { %142 = vlog2.f32 %v90_v7 }
  0x45   :  { %v137_v16 = vpop.eup %136 }
  0x46   :  { %v139_v17 = vpop.eup %138  ;;  %v101_v18 = vmul.f32 %v137_v16, %v99_v14 }
  0x47   :  { %v141_v19 = vpop.eup %140  ;;  %v102_v20 = vmul.f32 %v139_v17, %v100_v15 }
  0x48   :  { %v143_v21 = vpop.eup %142  ;;  %v96_v22 = vmul.f32 0.6931472, %v141_v19 }
  0x49   :  { %v98_v23 = vmul.f32 0.6931472, %v143_v21 }
  0x4a   :  { %v103_v24 = vadd.f32 %v101_v18, %v96_v22 }
  0x4b   :  { %v104_v25 = vadd.f32 %v102_v20, %v98_v23 }
  0x4d   :  { %v106_v26 = vadd.f32 %v104_v25, %v103_v24 }
  0x4f   :  { %108 = vst [vmem:[#allocation8] sm:$0xff] %v106_v26 }
  0x50   :  { %215 = shalt.err (!%p212_p5)
}
  0x51   :  { %118 = dma.vmem_to_hbm [thread:$0]  %s116_s2, 128, %s271_s3, [#allocation4]  }
  0x52   :  { %228 = dma.done.wait [#allocation4], 128  }
  0x53   :  { %229 = vsyncadd [#allocation4], 4294967168 }
  0x54   :  { %122 = vsyncpa [#allocation3], 1 }
  0x55   :  { %123 = vsyncpa [#allocation6], 1 }
  0x56   :  { %124 = vsyncpa [#allocation4], 1 }

</bundles_post_ra>
